<compile_context>
chip_gen: v7x
topology: tpu7x:2x2x1
jax: 0.10.0
libtpu: 0.0.40
codegen_flags: <defaults>
</compile_context>

<pallas_src>
import math

import jax
import jax.numpy as jnp
from jax.experimental import pallas as pl
from jax.experimental.pallas import tpu as pltpu


def _round_up(x, m):
    return ((x + m - 1) // m) * m


def _vmem_capacity_bytes():
    """Physical per-TensorCore VMEM; falls back to the 128 MiB v5e/v6e value."""
    try:
        return int(pltpu.get_tpu_info().vmem_capacity_bytes)
    except Exception:
        return 128 << 20


def _make_kernel(hw, thw, mask_tail):
    """hw/thw: true spatial size and spatial tile (static Python ints)."""
    inv_hw = 1.0 / float(hw)

    def kernel(x_ref, w1t_ref, b1_ref, w2t_ref, b2_ref, o_ref, acc_ref):
        # x_ref: (TB, C, THW); acc_ref: (TB, C) f32; o_ref: (TB, C)
        k = pl.program_id(1)

        @pl.when(k == 0)
        def _():
            acc_ref[...] = jnp.zeros_like(acc_ref)

        x = x_ref[...]
        if mask_tail:
            # Ragged spatial tail: the overhang of a partial input block is
            # stale VMEM, so zero it before accumulating.
            lane = jax.lax.broadcasted_iota(jnp.int32, x.shape, 2)
            x = jnp.where(lane < (hw - k * thw), x, jnp.zeros_like(x))
        # Partial spatial sum, accumulated in f32 regardless of input dtype.
        acc_ref[...] += jnp.sum(x, axis=-1, dtype=jnp.float32)

        @pl.when(k == pl.num_programs(1) - 1)
        def _():
            # Finalize: mean, then the two 1x1 convs as dense matmuls + ReLU.
            gap = acc_ref[...] * inv_hw                                    # (TB, C)
            h = jnp.dot(gap, w1t_ref[...],
                        preferred_element_type=jnp.float32) + b1_ref[...]  # (TB, Cr)
            h = jnp.maximum(h, 0.0)
            out = jnp.dot(h, w2t_ref[...],
                          preferred_element_type=jnp.float32) + b2_ref[...]  # (TB, C)
            o_ref[...] = out.astype(o_ref.dtype)

    return kernel


def channel_attention(x, w1, b1, w2, b2):
    """x: (N, C, H, W); w1: (C//r, C, 1, 1); b1: (C//r,); w2: (C, C//r, 1, 1); b2: (C,).

    Returns (N, C, 1, 1): GAP -> 1x1 conv -> ReLU -> 1x1 conv (no sigmoid/rescale).
    """
    N, C, H, W = x.shape
    Cr = w1.shape[0]
    HW = H * W
    itm = jnp.dtype(x.dtype).itemsize

    # ---- generation-aware VMEM budgets -------------------------------------
    vmem_cap = _vmem_capacity_bytes()
    if vmem_cap <= (64 << 20):            # v7x-class part: 64 MiB / TensorCore
        x_budget, vmem_target = 14 << 20, 48 << 20
    else:                                 # v5e / v6e: 128 MiB / TensorCore
        x_budget, vmem_target = 48 << 20, 96 << 20

    # ---- spatial tile: prefer the full contiguous HW extent -----------------
    TB_MIN = 8
    thw_budget = max(128, (x_budget // (2 * TB_MIN * C * itm)) // 128 * 128)
    THW = HW if HW <= thw_budget else thw_budget       # full dim or 128-multiple
    mask_tail = (THW < HW) and (HW % THW != 0)

    # ---- batch tile: multiple of 8 within budget; >=2 "parallel" steps ------
    if N < TB_MIN:
        TB = N                                         # full batch extent
    else:
        max_tb = max(TB_MIN, (x_budget // (2 * C * THW * itm)) // 8 * 8)
        # Largest mult-of-8 tile that still gives >=2 batch grid steps when
        # N > 8, so the "parallel" axis spans both v7x TensorCores.
        split_tb = min(_round_up(pl.cdiv(N, 2), 8), max(TB_MIN, ((N - 1) // 8) * 8))
        TB = min(128, max_tb, split_tb)

    N_out = _round_up(N, TB)          # pad ONLY the tiny output: full writebacks
    grid = (pl.cdiv(N, TB), pl.cdiv(HW, THW))

    # ---- glue (cheap, fused under jit): flatten spatial, prep weights -------
    x_flat = x.reshape(N, C, HW)      # no jnp.pad: x is streamed as-is
    w1t = w1.reshape(Cr, C).T         # (C, Cr)
    w2t = w2.reshape(C, Cr).T         # (Cr, C)
    b1r = b1.reshape(1, Cr)
    b2r = b2.reshape(1, C)

    # ---- VMEM limit: cover what we actually allocate, within the part -------
    needed = (2 * TB * C * THW * itm            # double-buffered x tiles
              + 2 * (2 * C * Cr + C + Cr) * 4   # double-buffered weights/biases
              + 2 * TB * C * itm                # output block
              + TB * C * 4                      # f32 accumulator scratch
              + (4 << 20))                      # compiler headroom
    vmem_limit = int(max(32 << 20, min(needed, vmem_target)))
    if needed > vmem_limit:
        # Extreme C: even minimum (TB=8, THW=128) tiles exceed the normal
        # target — raise the limit as far as the hardware allows.
        vmem_limit = int(min(needed, vmem_cap))

    flops = N * C * HW + 4 * N * C * Cr
    bytes_accessed = (N * C * HW * itm          # single pass over x (dominant)
                      + 2 * C * Cr * 4 + (C + Cr) * 4
                      + N_out * C * itm)

    out = pl.pallas_call(
        _make_kernel(HW, THW, mask_tail),
        out_shape=jax.ShapeDtypeStruct((N_out, C), x.dtype),
        grid_spec=pltpu.PrefetchScalarGridSpec(
            num_scalar_prefetch=0,
            grid=grid,
            in_specs=[
                pl.BlockSpec((TB, C, THW), lambda n, k: (n, 0, k)),
                # Constant-index weight/bias operands. (Single-buffering them
                # via pipeline_mode=pl.Buffered(1) would save a little VMEM at
                # very large C; negligible here, so defaults are kept.)
                pl.BlockSpec((C, Cr), lambda n, k: (0, 0)),
                pl.BlockSpec((1, Cr), lambda n, k: (0, 0)),
                pl.BlockSpec((Cr, C), lambda n, k: (0, 0)),
                pl.BlockSpec((1, C), lambda n, k: (0, 0)),
            ],
            out_specs=pl.BlockSpec((TB, C), lambda n, k: (n, 0)),
            scratch_shapes=[pltpu.VMEM((TB, C), jnp.float32)],
        ),
        compiler_params=pltpu.CompilerParams(
            dimension_semantics=("parallel", "arbitrary"),
            vmem_limit_bytes=vmem_limit,
        ),
        cost_estimate=pl.CostEstimate(
            flops=flops, transcendentals=0, bytes_accessed=bytes_accessed),
    )(x_flat, w1t, b1r, w2t, b2r)

    return out[:N].reshape(N, C, 1, 1)


def _init_params(key, dim, reduction):
    """Deterministic init matching PyTorch Conv2d default bounds."""
    hidden = dim // reduction
    k1, k2, k3, k4 = jax.random.split(key, 4)

    bound1 = 1.0 / math.sqrt(dim)      # fan_in of conv1 = dim * 1 * 1
    w1 = jax.random.uniform(k1, (hidden, dim, 1, 1), jnp.float32, -bound1, bound1)
    b1 = jax.random.uniform(k2, (hidden,), jnp.float32, -bound1, bound1)

    bound2 = 1.0 / math.sqrt(hidden)   # fan_in of conv2 = hidden * 1 * 1
    w2 = jax.random.uniform(k3, (dim, hidden, 1, 1), jnp.float32, -bound2, bound2)
    b2 = jax.random.uniform(k4, (dim,), jnp.float32, -bound2, bound2)
    return w1, b1, w2, b2


def _reference(x, w1, b1, w2, b2):
    # Pure-JAX reference for correctness check.
    N, C, H, W = x.shape
    Cr = w1.shape[0]
    gap = jnp.mean(x, axis=(2, 3))                      # (N, C)
    h = gap @ w1.reshape(Cr, C).T + b1                  # (N, Cr)
    h = jnp.maximum(h, 0.0)
    out = h @ w2.reshape(C, Cr).T + b2                  # (N, C)
    return out.reshape(N, C, 1, 1)


if __name__ == "__main__":
    key = jax.random.PRNGKey(0)
    reduction = 8
    fn = jax.jit(channel_attention)

    # Primary small case, plus a ragged-batch case (N not a multiple of the
    # 8-row batch tile) that exercises unpadded partial input blocks and the
    # 2-step "parallel" batch axis.
    for (N, C, H, W) in [(2, 32, 16, 16), (10, 32, 7, 7)]:
        k_x, k_p, key = jax.random.split(key, 3)
        x = jax.random.normal(k_x, (N, C, H, W), dtype=jnp.float32)
        w1, b1, w2, b2 = _init_params(k_p, C, reduction)

        out = jax.block_until_ready(fn(x, w1, b1, w2, b2))
        ref = _reference(x, w1, b1, w2, b2)
        assert out.shape == (N, C, 1, 1)
        assert jnp.allclose(out, ref, atol=1e-5, rtol=1e-5), \
            f"mismatch vs reference for shape {(N, C, H, W)}"

    print("KERNEL_OK")
</pallas_src>

<mosaic_0001>
module attributes {stable_mosaic.version = 11 : i64} {
  func.func @kernel(%arg0: i32, %arg1: i32, %arg2: memref<2x32x256xf32, #tpu.memory_space<vmem>>, %arg3: memref<32x4xf32, #tpu.memory_space<vmem>>, %arg4: memref<1x4xf32, #tpu.memory_space<vmem>>, %arg5: memref<4x32xf32, #tpu.memory_space<vmem>>, %arg6: memref<1x32xf32, #tpu.memory_space<vmem>>, %arg7: memref<2x32xf32, #tpu.memory_space<vmem>>, %arg8: memref<2x32xf32, #tpu.memory_space<vmem>>) attributes {dimension_semantics = [#tpu.dimension_semantics<parallel>, #tpu.dimension_semantics<arbitrary>], iteration_bounds = array<i64: 1, 1>, scalar_prefetch = 0 : i64, scratch_operands = 1 : i64, tpu.core_type = #tpu.core_type<tc>, window_params = [{transform_indices = @transform_0, window_bounds = array<i64: 2, 32, 256>}, {pipeline_mode = #tpu.pipeline_mode<synchronous>, transform_indices = @transform_1, window_bounds = array<i64: 32, 4>}, {pipeline_mode = #tpu.pipeline_mode<synchronous>, transform_indices = @transform_2, window_bounds = array<i64: 1, 4>}, {pipeline_mode = #tpu.pipeline_mode<synchronous>, transform_indices = @transform_3, window_bounds = array<i64: 4, 32>}, {pipeline_mode = #tpu.pipeline_mode<synchronous>, transform_indices = @transform_4, window_bounds = array<i64: 1, 32>}, {transform_indices = @transform_5, window_bounds = array<i64: 2, 32>}]} {
    %c0_i32 = arith.constant 0 : i32
    %0 = arith.cmpi eq, %arg1, %c0_i32 : i32
    %1 = arith.extui %0 : i1 to i32
    %c0_i32_0 = arith.constant 0 : i32
    %2 = arith.cmpi ne, %1, %c0_i32_0 : i32
    scf.if %2 {
      %cst_9 = arith.constant 0.000000e+00 : f32
      %11 = vector.broadcast %cst_9 : f32 to vector<2x32xf32>
      %c0_10 = arith.constant 0 : index
      %c0_11 = arith.constant 0 : index
      %12 = vector.load %arg8[%c0_10, %c0_11] : memref<2x32xf32, #tpu.memory_space<vmem>>, vector<2x32xf32>
      tpu.vector_store %arg8[%c0_10, %c0_11], %11 {strides = array<i32>} : memref<2x32xf32, #tpu.memory_space<vmem>>, vector<2x32xf32>,
    } else {
    }
    %c0 = arith.constant 0 : index
    %c0_1 = arith.constant 0 : index
    %c0_2 = arith.constant 0 : index
    %3 = vector.load %arg2[%c0, %c0_1, %c0_2] : memref<2x32x256xf32, #tpu.memory_space<vmem>>, vector<2x32x256xf32>
    %c0_3 = arith.constant 0 : index
    %c0_4 = arith.constant 0 : index
    %4 = vector.load %arg8[%c0_3, %c0_4] : memref<2x32xf32, #tpu.memory_space<vmem>>, vector<2x32xf32>
    %cst = arith.constant dense<0.000000e+00> : vector<2x32xf32>
    %5 = vector.multi_reduction <add>, %3, %cst [2] : vector<2x32x256xf32> to vector<2x32xf32>
    %6 = arith.addf %4, %5 : vector<2x32xf32>
    %c0_5 = arith.constant 0 : index
    %c0_6 = arith.constant 0 : index
    %7 = vector.load %arg8[%c0_5, %c0_6] : memref<2x32xf32, #tpu.memory_space<vmem>>, vector<2x32xf32>
    tpu.vector_store %arg8[%c0_5, %c0_6], %6 {strides = array<i32>} : memref<2x32xf32, #tpu.memory_space<vmem>>, vector<2x32xf32>,
    %c0_i32_7 = arith.constant 0 : i32
    %8 = arith.cmpi eq, %arg1, %c0_i32_7 : i32
    %9 = arith.extui %8 : i1 to i32
    %c0_i32_8 = arith.constant 0 : i32
    %10 = arith.cmpi ne, %9, %c0_i32_8 : i32
    scf.if %10 {
      %c0_9 = arith.constant 0 : index
      %c0_10 = arith.constant 0 : index
      %11 = vector.load %arg8[%c0_9, %c0_10] : memref<2x32xf32, #tpu.memory_space<vmem>>, vector<2x32xf32>
      %cst_11 = arith.constant 3.906250e-03 : f32
      %12 = vector.broadcast %cst_11 : f32 to vector<2x32xf32>
      %13 = arith.mulf %11, %12 : vector<2x32xf32>
      %c0_12 = arith.constant 0 : index
      %c0_13 = arith.constant 0 : index
      %14 = vector.load %arg3[%c0_12, %c0_13] : memref<32x4xf32, #tpu.memory_space<vmem>>, vector<32x4xf32>
      %cst_14 = arith.constant dense<0.000000e+00> : vector<2x4xf32>
      %15 = tpu.matmul %13, %14, %cst_14 {dimension_numbers = #tpu.dot_dimension_numbers<[1], [0], [0], [1], [0, 0, 1, 1], [], []>} : vector<2x32xf32>, vector<32x4xf32>, vector<2x4xf32> -> vector<2x4xf32>
      %c0_15 = arith.constant 0 : index
      %c0_16 = arith.constant 0 : index
      %16 = vector.load %arg4[%c0_15, %c0_16] : memref<1x4xf32, #tpu.memory_space<vmem>>, vector<1x4xf32>
      %17 = vector.broadcast %16 : vector<1x4xf32> to vector<2x4xf32>
      %18 = arith.addf %15, %17 : vector<2x4xf32>
      %cst_17 = arith.constant 0.000000e+00 : f32
      %19 = vector.broadcast %cst_17 : f32 to vector<2x4xf32>
      %20 = arith.maximumf %18, %19 : vector<2x4xf32>
      %c0_18 = arith.constant 0 : index
      %c0_19 = arith.constant 0 : index
      %21 = vector.load %arg5[%c0_18, %c0_19] : memref<4x32xf32, #tpu.memory_space<vmem>>, vector<4x32xf32>
      %cst_20 = arith.constant dense<0.000000e+00> : vector<2x32xf32>
      %22 = tpu.matmul %20, %21, %cst_20 {dimension_numbers = #tpu.dot_dimension_numbers<[1], [0], [0], [1], [0, 0, 1, 1], [], []>} : vector<2x4xf32>, vector<4x32xf32>, vector<2x32xf32> -> vector<2x32xf32>
      %c0_21 = arith.constant 0 : index
      %c0_22 = arith.constant 0 : index
      %23 = vector.load %arg6[%c0_21, %c0_22] : memref<1x32xf32, #tpu.memory_space<vmem>>, vector<1x32xf32>
      %24 = vector.broadcast %23 : vector<1x32xf32> to vector<2x32xf32>
      %25 = arith.addf %22, %24 : vector<2x32xf32>
      %c0_23 = arith.constant 0 : index
      %c0_24 = arith.constant 0 : index
      %26 = vector.load %arg7[%c0_23, %c0_24] : memref<2x32xf32, #tpu.memory_space<vmem>>, vector<2x32xf32>
      tpu.vector_store %arg7[%c0_23, %c0_24], %25 {strides = array<i32>} : memref<2x32xf32, #tpu.memory_space<vmem>>, vector<2x32xf32>,
    } else {
    }
    return
  }
  func.func @transform_0(%arg0: i32, %arg1: i32) -> (i32, i32, i32) {
    %c0_i32 = arith.constant 0 : i32
    %c0_i32_0 = arith.constant 0 : i32
    return %arg0, %c0_i32, %arg1 : i32, i32, i32
  }
  func.func @transform_1(%arg0: i32, %arg1: i32) -> (i32, i32) {
    %c0_i32 = arith.constant 0 : i32
    %c0_i32_0 = arith.constant 0 : i32
    %c0_i32_1 = arith.constant 0 : i32
    return %c0_i32, %c0_i32_0 : i32, i32
  }
  func.func @transform_2(%arg0: i32, %arg1: i32) -> (i32, i32) {
    %c0_i32 = arith.constant 0 : i32
    %c0_i32_0 = arith.constant 0 : i32
    %c0_i32_1 = arith.constant 0 : i32
    return %c0_i32, %c0_i32_0 : i32, i32
  }
  func.func @transform_3(%arg0: i32, %arg1: i32) -> (i32, i32) {
    %c0_i32 = arith.constant 0 : i32
    %c0_i32_0 = arith.constant 0 : i32
    %c0_i32_1 = arith.constant 0 : i32
    return %c0_i32, %c0_i32_0 : i32, i32
  }
  func.func @transform_4(%arg0: i32, %arg1: i32) -> (i32, i32) {
    %c0_i32 = arith.constant 0 : i32
    %c0_i32_0 = arith.constant 0 : i32
    %c0_i32_1 = arith.constant 0 : i32
    return %c0_i32, %c0_i32_0 : i32, i32
  }
  func.func @transform_5(%arg0: i32, %arg1: i32) -> (i32, i32) {
    %c0_i32 = arith.constant 0 : i32
    %c0_i32_0 = arith.constant 0 : i32
    return %arg0, %c0_i32 : i32, i32
  }
}

</mosaic_0001>

<bundles_post_ra>
// kernel: channel_attention.1
= control target key start
LH: loop header
LB: loop body
LE: loop exit
PB: predicated region body
PF: predicated region fallthrough
CT: control target
= control target key end

     0   :  { %s500_s0 = inlined_call_operand.vmem [shape: f32[2,32,256], index: 0, kind: input, shape index: {}]   ;;  %s501_s1 = inlined_call_operand.vmem [shape: f32[32,4], index: 1, kind: input, shape index: {}]   ;;  %s502_s2 = inlined_call_operand.vmem [shape: f32[1,4], index: 2, kind: input, shape index: {}]   ;;  %s503_s3 = inlined_call_operand.vmem [shape: f32[4,32], index: 3, kind: input, shape index: {}]   ;;  %s504_s4 = inlined_call_operand.vmem [shape: f32[1,32], index: 4, kind: input, shape index: {}]   ;;  %s505_s5 = inlined_call_operand.hbm [shape: f32[2,32], index: 5, kind: output, shape index: {}]  }
   0x1   :  { %v35_v0 = vld [vmem:[%s500_s0 + $0x40] sm:$0xff]  ;;  %v36_v1 = vld [vmem:[%s500_s0 + $0x48] sm:$0xff]  ;;  %v37_v5 = vld [vmem:[%s500_s0 + $0x50] sm:$0xff] }
   0x2   :  { %v27_v2 = vld [vmem:[%s500_s0] sm:$0xff]  ;;  %v56_v3 = vadd.f32 %v36_v1, %v35_v0  ;;  %v28_v4 = vld [vmem:[%s500_s0 + $0x8] sm:$0xff]  ;;  %v38_v6 = vld [vmem:[%s500_s0 + $0x58] sm:$0xff] }
   0x3   :  { %v44_v7 = vadd.f32 %v28_v4, %v27_v2  ;;  %v29_v8 = vld [vmem:[%s500_s0 + $0x10] sm:$0xff]  ;;  %v30_v9 = vld [vmem:[%s500_s0 + $0x18] sm:$0xff]  ;;  %v59_v10 = vadd.f32 %v38_v6, %v37_v5  ;;  %v39_v12 = vld [vmem:[%s500_s0 + $0x60] sm:$0xff] }
   0x4   :  { %57 = vadd.xlane.f32.xlu1 %v56_v3  ;;  %v47_v11 = vadd.f32 %v30_v9, %v29_v8  ;;  %v40_v13 = vld [vmem:[%s500_s0 + $0x68] sm:$0xff]  ;;  %v31_v14 = vld [vmem:[%s500_s0 + $0x20] sm:$0xff] }
   0x5   :  { %45 = vadd.xlane.f32.xlu0 %v44_v7  ;;  %v32_v15 = vld [vmem:[%s500_s0 + $0x28] sm:$0xff] }
   0x6   :  { %10 = vsyncpa [#allocation4], 0  ;;  %v62_v16 = vadd.f32 %v40_v13, %v39_v12  ;;  %v50_v17 = vadd.f32 %v32_v15, %v31_v14  ;;  %v41_v18 = vld [vmem:[%s500_s0 + $0x70] sm:$0xff]  ;;  %v42_v19 = vld [vmem:[%s500_s0 + $0x78] sm:$0xff]  ;;  %vm25_vm0 = vcmask 254976   ;;  %v382_v24 = vmov 0.0  }
   0x7   :  { %v33_v20 = vld [vmem:[%s500_s0 + $0x30] sm:$0xff]  ;;  %v34_v21 = vld [vmem:[%s500_s0 + $0x38] sm:$0xff]  ;;  %v65_v22 = vadd.f32 %v42_v19, %v41_v18  ;;  %26 = vst.msk [vmem:[#allocation2] sm:$0x3] %vm25_vm0, %v382_v24  ;;  %343 = vmatprep.subr.mxu1 %v382_v24  ;;  %v133_v25 = vld [vmem:[%s501_s1] sm:$0xff]  ;;  %v383_v28 = vmov 0.0|0.0   ;;  %v76_v32 = vlaneseq }
   0x8   :  { %60 = vadd.xlane.f32.xlu1 %v59_v10  ;;  %v53_v23 = vadd.f32 %v34_v21, %v33_v20  ;;  %v134_v26 = vld [vmem:[%s501_s1 + $0x8] sm:$0xff]  ;;  %v135_v27 = vld [vmem:[%s501_s1 + $0x10] sm:$0xff]  ;;  %348 = vmatprep.subr.bf16.mxu0 %v383_v28  ;;  %v136_v30 = vld [vmem:[%s501_s1 + $0x18] sm:$0xff]  ;;  %vm384_vm1 = vmmov 0   ;;  %vm87_vm2 = vcmask 130112   ;;  %vm94_vm3 = vcmask 195712  }
   0x9   :  { %48 = vadd.xlane.f32.xlu0 %v47_v11  ;;  %v349_v29 = vpack.c.bf16 %v134_v26, %v133_v25  ;;  %v352_v31 = vpack.c.bf16 %v136_v30, %v135_v27  ;;  %340 = vmatprep.mubr.msk.f32.mxu0 %vm384_vm1, %v382_v24  ;;  %v77_v33 = vand.u32 127, %v76_v32  ;;  %v79_v38 = vshrl.u32 %v76_v32, 7  ;;  %v219_v5 = vld [vmem:[%s503_s3] sm:$0xf]  ;;  %s385_s12 = smov [#allocation3]  }
   0xa   :  { %345 = vmatprep.mubr.msk.f32.mxu1 %vm384_vm1, %v382_v24  ;;  %vm101_vm4 = vcmask 261312   ;;  %vm122_vm5 = vcmask 1041409   ;;  %vm144_vm6 = vcmask 261120   ;;  %vm231_vm7 = vcmask 1043456   ;;  %v320_v6 = vld [vmem:[%s502_s2] ss:$0 sm:$0xff] }
   0xb   :  { %350 = vmatpush3.bf16.msra.mxu0 %v349_v29  ;;  %v82_v36 = vadd.s32 4294967288, %v77_v33  ;;  %v89_v37 = vadd.s32 4294967280, %v77_v33  ;;  %v96_v42 = vadd.s32 4294967272, %v77_v33  ;;  %v80_v44 = vsub.s32 %v77_v33, %v79_v38  ;;  %344 = vmatpush3.msk.msra.mxu1 %vm231_vm7, %v219_v5  ;;  %v322_v11 = vld [vmem:[%s504_s4] ss:$0 sm:$0xff]  ;;  %s312_s13 = sshll.u32 %s385_s12, 4  ;;  %s313_s13 = int_to_ptr.vmem [resolvable:$true] %s312_s13 }
   0xc   :  { %63 = vadd.xlane.f32.xlu1 %v62_v16  ;;  %351 = vmatprep.subr.bf16.mxu0 %v383_v28  ;;  %vm227_vm8 = vcmask 31744   ;;  %s358_s3 = scalar_lea.vmem %s313_s13, 32  ;;  %p363_p1 = scmp.lt.s32.totalorder %s313_s13, %s313_s13 }
   0xd   :  { %51 = vadd.xlane.f32.xlu0 %v50_v17  ;;  %v85_v40 = vsub.s32 %v82_v36, %v79_v38  ;;  %v92_v43 = vsub.s32 %v89_v37, %v79_v38  ;;  %v99_v48 = vsub.s32 %v96_v42, %v79_v38  ;;  %p359_p0 = scmp.ne.s32.totalorder %s313_s13, %s358_s3  ;;  %p364_p2 = scmp.lt.s32.totalorder %s358_s3, %s358_s3 }
   0xe   :  { %v43_v63 = vld [vmem:[#allocation2] sm:$0x3] }
   0xf   :  { %353 = vmatpush3.bf16.msra.mxu0 %v352_v31  ;;  %p365_p3 = por %p364_p2, %p363_p1 }
  0x10   :  { %66 = vadd.xlane.f32.xlu1 %v65_v22 }
  0x11   :  { %54 = vadd.xlane.f32.xlu0 %v53_v23  ;;  %p366_p4 = pnand %p365_p3, %p359_p0 }
  0x91   :  { %v58_v34 = vpop.xlane.xlu1 %57 }
  0x92   :  { %v46_v35 = vpop.xlane.xlu0 %45  ;;  %v106_v51 = vrot.slane %v58_v34, %v80_v44 }
  0x93   :  { %v81_v53 = vrot.slane %v46_v35, %v80_v44 }
  0x95   :  { %v61_v39 = vpop.xlane.xlu1 %60 }
  0x96   :  { %v49_v41 = vpop.xlane.xlu0 %48  ;;  %v110_v46 = vrot.slane %v61_v39, %v85_v40 }
  0x97   :  { %v86_v49 = vrot.slane %v49_v41, %v85_v40 }
  0x98   :  { %v111_v55 = vsel %vm87_vm2, %v110_v46, %v106_v51 }
  0x99   :  { %v64_v45 = vpop.xlane.xlu1 %63  ;;  %v88_v58 = vsel %vm87_vm2, %v86_v49, %v81_v53 }
  0x9a   :  { %v52_v47 = vpop.xlane.xlu0 %51  ;;  %v115_v50 = vrot.slane %v64_v45, %v92_v43 }
  0x9b   :  { %v93_v52 = vrot.slane %v52_v47, %v92_v43 }
  0x9c   :  { %v116_v59 = vsel %vm94_vm3, %v115_v50, %v111_v55 }
  0x9d   :  { %v67_v54 = vpop.xlane.xlu1 %66  ;;  %v95_v61 = vsel %vm94_vm3, %v93_v52, %v88_v58 }
  0x9e   :  { %v120_v56 = vrot.slane %v67_v54, %v99_v48  ;;  %v55_v57 = vpop.xlane.xlu0 %54 }
  0x9f   :  { %v100_v60 = vrot.slane %v55_v57, %v99_v48 }
  0xa0   :  { %v121_v62 = vsel %vm101_vm4, %v120_v56, %v116_v59 }
  0xa1   :  { %v102_v0 = vsel %vm101_vm4, %v100_v60, %v95_v61 }
  0xa2   :  { %v123_v1 = vsel %vm122_vm5, %v121_v62, %v102_v0 }
  0xa3   :  { %v125_v2 = vadd.f32 %v123_v1, %v43_v63 }
  0xa5   :  { %127 = vst.msk [vmem:[#allocation2] sm:$0x3] %vm25_vm0, %v125_v2 }
  0xac   :  { %v131_v3 = vld [vmem:[#allocation2] sm:$0x3] }
  0xad   :  { %v132_v4 = vmul.f32 0.00390625, %v131_v3 }
  0xaf   :  { %341 = vmatmul.mubr.msk.f32.vlgmr.msra.gmra.mrb[0].mxu0 %vm144_vm6, %v132_v4 }
 0x182   :  { %v214_v7 = vpop.f32.mrb[0].mxu0 }
 0x183   :  { %v215_v8 = vadd.f32 %v320_v6, %v214_v7  ;;  %v342_v9 = vpop.f32.mrb[1].mxu0 }
 0x185   :  { %v218_v10 = vmax.f32 %v215_v8, 0.0 }
 0x187   :  { %346 = vmatmul.mubr.msk.f32.vlgmr.msra.gmra.mrb[0].mxu1 %vm227_vm8, %v218_v10 }
 0x25a   :  { %v301_v12 = vpop.f32.mrb[0].mxu1 }
 0x25b   :  { %v302_v13 = vadd.f32 %v322_v11, %v301_v12  ;;  %v347_v14 = vpop.f32.mrb[1].mxu1 }
 0x25d   :  { %305 = vst.msk [vmem:[#allocation3] sm:$0x3] %vm25_vm0, %v302_v13 }
 0x25e   :  { %369 = shalt.err (!%p366_p4)
}
 0x25f   :  { %s370_s15 = scalar_lea.hbm %s505_s5, 32 }
 0x260   :  { %p371_p5 = scmp.ne.s32.totalorder %s505_s5, %s370_s15  ;;  %p374_p6 = scmp.lt.u32.totalorder %s370_s15, %s505_s5 }
 0x262   :  { %p376_p7 = pnand %p374_p6, %p371_p5 }
 0x264   :  { %379 = shalt.err (!%p376_p7)
}
 0x265   :  { %315 = dma.vmem_to_hbm [thread:$0]  %s313_s13, 32, %s505_s5, [#allocation4]  }
 0x266   :  { %380 = dma.done.wait [#allocation4], 32  }
 0x267   :  { %381 = vsyncadd [#allocation4], 4294967264 }
 0x268   :  { %319 = vsyncpa [#allocation4], 1 }

</bundles_post_ra>
